<compile_context>
chip_gen: v7x
topology: tpu7x:2x2x1
jax: 0.10.0
libtpu: 0.0.40
codegen_flags: <defaults>
</compile_context>

<pallas_src>
import jax
import jax.numpy as jnp
from jax.experimental import pallas as pl
from jax.experimental.pallas import tpu as pltpu

LAYER_NORM_EPS = 1e-12
MASK_NEG = 1e30          # float32 path of the PyTorch module


def _end_logits_kernel(h_ref, s_ref, w0h_ref, w0s_ref, b0_ref, w1p_ref, b1p_ref,
                       out_ref):
    """One (1, tS, H) hidden tile.

    s_ref is either the single gathered start row (1, 1, H) — its projection is
    computed once and broadcast over the tile — or a per-token (1, tS, H) tile
    when explicit start_states are supplied. Same body handles both.
    """
    h = h_ref[0].astype(jnp.bfloat16)              # (tS, H) bf16 for the MXU
    s = s_ref[0].astype(jnp.bfloat16)              # (1, H) or (tS, H)

    # dense_0 on concat([h, s]) == h @ W0h + s @ W0s + b0 (weights pre-transposed, bf16).
    x = jnp.dot(h, w0h_ref[...], preferred_element_type=jnp.float32)
    sv = jnp.dot(s, w0s_ref[...], preferred_element_type=jnp.float32)
    x = x + sv + b0_ref[...]                       # (tS,H) + (1,H) broadcast (row path)

    # tanh + LayerNorm (f32, biased variance like torch.nn.LayerNorm).
    x = jnp.tanh(x)
    mean = jnp.mean(x, axis=-1, keepdims=True)
    var = jnp.mean(jnp.square(x - mean), axis=-1, keepdims=True)
    xn = (x - mean) * jax.lax.rsqrt(var + LAYER_NORM_EPS)

    # dense_1 with the LayerNorm affine folded in: VPU multiply + lane reduce.
    logits = jnp.sum(xn * w1p_ref[...], axis=-1, keepdims=True) + b1p_ref[0, 0]
    out_ref[0] = logits                            # (tS, 1)


def _choose_s_tile(S):
    for t in (512, 256, 128):
        if S % t == 0:
            return t
    return S


def pooler_end_logits(hidden_states, packed_params, start_states=None,
                      start_positions=None, p_mask=None):
    """hidden_states: (B, S, H) float32. Returns end logits of shape (B, S) float32."""
    B, S, H = hidden_states.shape
    assert start_states is not None or start_positions is not None
    w0h, w0s, b0, w1p, b1p = packed_params

    ts = _choose_s_tile(S)
    ns = S // ts

    if start_positions is not None:
        # Gather only the start-token row; the kernel broadcasts its projection.
        idx = jnp.broadcast_to(start_positions[:, None, None], (B, 1, H))
        start_in = jnp.take_along_axis(hidden_states, idx, axis=1)       # (B, 1, H)
        start_spec = pl.BlockSpec((1, 1, H), lambda b, si: (b, 0, 0))
    else:
        start_in = start_states                                           # (B, S, H)
        start_spec = pl.BlockSpec((1, ts, H), lambda b, si: (b, si, 0))

    const = lambda a: pl.BlockSpec(a.shape, lambda b, si: (0, 0))

    out = pl.pallas_call(
        _end_logits_kernel,
        out_shape=jax.ShapeDtypeStruct((B, S, 1), jnp.float32),
        grid_spec=pltpu.PrefetchScalarGridSpec(
            num_scalar_prefetch=0,
            grid=(B, ns),
            in_specs=[
                pl.BlockSpec((1, ts, H), lambda b, si: (b, si, 0)),   # hidden tile
                start_spec,                                           # start row / tile
                const(w0h), const(w0s), const(b0),                    # dense_0 (bf16 W)
                const(w1p), const(b1p),                               # folded dense_1
            ],
            out_specs=pl.BlockSpec((1, ts, 1), lambda b, si: (b, si, 0)),
        ),
        compiler_params=pltpu.CompilerParams(
            dimension_semantics=("parallel", "parallel"),
            vmem_limit_bytes=64 * 1024 * 1024),
    )(hidden_states, start_in, w0h, w0s, b0, w1p, b1p)

    logits = out[..., 0]                                                  # (B, S)
    if p_mask is not None:
        pm = p_mask.astype(logits.dtype)
        logits = logits * (1.0 - pm) - MASK_NEG * pm
    return logits


def pack_params(w0, b0, gamma, beta, w1, b1):
    """Repack PyTorch-layout parameters for the kernel.
       dense_0: w0 (H, 2H), b0 (H,);  LayerNorm: gamma/beta (H,);
       dense_1: w1 (1, H), b1 (1,).
       * W0 is split into hidden/start halves, pre-transposed, and stored bf16.
       * LayerNorm affine folded into dense_1: w1' = gamma*w1, b1' = b1 + beta.w1.
    """
    H = b0.shape[0]
    w0h = w0[:, :H].T.astype(jnp.bfloat16)          # (H, H): h @ w0h == h @ W0[:, :H].T
    w0s = w0[:, H:].T.astype(jnp.bfloat16)          # (H, H)
    w1_row = w1[0].astype(jnp.float32)              # (H,)
    w1p = (gamma * w1_row)[None, :].astype(jnp.float32)          # (1, H)
    b1p = (b1 + jnp.dot(beta, w1_row))[None, :].astype(jnp.float32)  # (1, 1)
    return (w0h, w0s, b0[None, :].astype(jnp.float32), w1p, b1p)


def init_params(key, hidden_size):
    """Synthetic parameters with the module's shapes. LayerNorm affine is randomized
       so the folded dense_1 path is actually exercised. Returns (raw, packed)."""
    H = hidden_size
    k0, k1, k2, k3, k4, k5 = jax.random.split(key, 6)
    bound0 = 1.0 / jnp.sqrt(2.0 * H)
    w0 = jax.random.uniform(k0, (H, 2 * H), jnp.float32, -bound0, bound0)
    b0 = jax.random.uniform(k1, (H,), jnp.float32, -bound0, bound0)
    bound1 = 1.0 / jnp.sqrt(1.0 * H)
    w1 = jax.random.uniform(k2, (1, H), jnp.float32, -bound1, bound1)
    b1 = jax.random.uniform(k3, (1,), jnp.float32, -bound1, bound1)
    gamma = 1.0 + 0.1 * jax.random.normal(k4, (H,), jnp.float32)
    beta = 0.1 * jax.random.normal(k5, (H,), jnp.float32)
    raw = (w0, b0, gamma, beta, w1, b1)
    return raw, pack_params(*raw)


def _reference(hidden_states, raw_params, start_states=None,
               start_positions=None, p_mask=None):
    """Pure-JAX mirror of PoolerEndLogits.forward (same bf16-input / f32-accumulation
       matmul precision choice as the kernel)."""
    w0, b0, gamma, beta, w1, b1 = raw_params
    B, S, H = hidden_states.shape
    if start_positions is not None:
        idx = jnp.broadcast_to(start_positions[:, None, None], (B, 1, H))
        start_states = jnp.broadcast_to(
            jnp.take_along_axis(hidden_states, idx, axis=1), (B, S, H))
    cat = jnp.concatenate([hidden_states, start_states], axis=-1)          # (B, S, 2H)
    x = jnp.dot(cat.astype(jnp.bfloat16), w0.T.astype(jnp.bfloat16),
                preferred_element_type=jnp.float32) + b0
    x = jnp.tanh(x)
    mean = x.mean(-1, keepdims=True)
    var = ((x - mean) ** 2).mean(-1, keepdims=True)
    x = (x - mean) / jnp.sqrt(var + LAYER_NORM_EPS) * gamma + beta
    x = jnp.dot(x, w1[0]) + b1[0]                                          # (B, S)
    if p_mask is not None:
        x = x * (1 - p_mask) - MASK_NEG * p_mask
    return x


if __name__ == "__main__":
    B, S, H = 2, 8, 32
    key = jax.random.PRNGKey(0)
    k_h, k_p, k_m, k_w, k_s = jax.random.split(key, 5)

    hidden_states = jax.random.normal(k_h, (B, S, H), jnp.float32)
    start_positions = jax.random.randint(k_p, (B,), 0, S)
    p_mask = (jax.random.uniform(k_m, (B, S)) < 0.25).astype(jnp.float32)
    raw_params, packed_params = init_params(k_w, H)

    # Path 1: start_positions (training path of SQuADHead.end_logits).
    out = pooler_end_logits(hidden_states, packed_params,
                            start_positions=start_positions, p_mask=p_mask)
    out = jax.block_until_ready(out)
    ref = _reference(hidden_states, raw_params,
                     start_positions=start_positions, p_mask=p_mask)
    assert out.shape == (B, S)
    assert jnp.allclose(out, ref, rtol=1e-3, atol=1e-3), "mismatch (start_positions path)"

    # Path 2: explicit per-token start_states (beam-search path of SQuADHead).
    start_states = jax.random.normal(k_s, (B, S, H), jnp.float32)
    out2 = pooler_end_logits(hidden_states, packed_params, start_states=start_states)
    out2 = jax.block_until_ready(out2)
    ref2 = _reference(hidden_states, raw_params, start_states=start_states)
    assert out2.shape == (B, S)
    assert jnp.allclose(out2, ref2, rtol=1e-3, atol=1e-3), "mismatch (start_states path)"

    print("KERNEL_OK")
</pallas_src>

<mosaic_0001>
module attributes {stable_mosaic.version = 11 : i64} {
  func.func @_end_logits_kernel(%arg0: i32, %arg1: i32, %arg2: memref<1x8x32xf32, #tpu.memory_space<vmem>>, %arg3: memref<1x1x32xf32, #tpu.memory_space<vmem>>, %arg4: memref<32x32xbf16, #tpu.memory_space<vmem>>, %arg5: memref<32x32xbf16, #tpu.memory_space<vmem>>, %arg6: memref<1x32xf32, #tpu.memory_space<vmem>>, %arg7: memref<1x32xf32, #tpu.memory_space<vmem>>, %arg8: memref<1x1xf32, #tpu.memory_space<vmem>>, %arg9: memref<1x8x1xf32, #tpu.memory_space<vmem>>) attributes {dimension_semantics = [#tpu.dimension_semantics<parallel>, #tpu.dimension_semantics<parallel>], iteration_bounds = array<i64: 2, 1>, scalar_prefetch = 0 : i64, scratch_operands = 0 : i64, tpu.core_type = #tpu.core_type<tc>, window_params = [{transform_indices = @transform_0, window_bounds = array<i64: 1, 8, 32>}, {transform_indices = @transform_1, window_bounds = array<i64: 1, 1, 32>}, {pipeline_mode = #tpu.pipeline_mode<synchronous>, transform_indices = @transform_2, window_bounds = array<i64: 32, 32>}, {pipeline_mode = #tpu.pipeline_mode<synchronous>, transform_indices = @transform_3, window_bounds = array<i64: 32, 32>}, {pipeline_mode = #tpu.pipeline_mode<synchronous>, transform_indices = @transform_4, window_bounds = array<i64: 1, 32>}, {pipeline_mode = #tpu.pipeline_mode<synchronous>, transform_indices = @transform_5, window_bounds = array<i64: 1, 32>}, {pipeline_mode = #tpu.pipeline_mode<synchronous>, transform_indices = @transform_6, window_bounds = array<i64: 1, 1>}, {transform_indices = @transform_7, window_bounds = array<i64: 1, 8, 1>}]} {
    %c0 = arith.constant 0 : index
    %c0_0 = arith.constant 0 : index
    %c0_1 = arith.constant 0 : index
    %0 = vector.load %arg2[%c0, %c0_0, %c0_1] : memref<1x8x32xf32, #tpu.memory_space<vmem>>, vector<1x8x32xf32>
    %1 = vector.shape_cast %0 : vector<1x8x32xf32> to vector<8x32xf32>
    %2 = arith.truncf %1 : vector<8x32xf32> to vector<8x32xbf16>
    %c0_2 = arith.constant 0 : index
    %c0_3 = arith.constant 0 : index
    %c0_4 = arith.constant 0 : index
    %3 = vector.load %arg3[%c0_2, %c0_3, %c0_4] : memref<1x1x32xf32, #tpu.memory_space<vmem>>, vector<1x1x32xf32>
    %4 = vector.shape_cast %3 : vector<1x1x32xf32> to vector<1x32xf32>
    %5 = arith.truncf %4 : vector<1x32xf32> to vector<1x32xbf16>
    %c0_5 = arith.constant 0 : index
    %c0_6 = arith.constant 0 : index
    %6 = vector.load %arg4[%c0_5, %c0_6] : memref<32x32xbf16, #tpu.memory_space<vmem>>, vector<32x32xbf16>
    %cst = arith.constant dense<0.000000e+00> : vector<8x32xf32>
    %7 = tpu.matmul %2, %6, %cst {dimension_numbers = #tpu.dot_dimension_numbers<[1], [0], [0], [1], [0, 0, 1, 1], [], []>} : vector<8x32xbf16>, vector<32x32xbf16>, vector<8x32xf32> -> vector<8x32xf32>
    %c0_7 = arith.constant 0 : index
    %c0_8 = arith.constant 0 : index
    %8 = vector.load %arg5[%c0_7, %c0_8] : memref<32x32xbf16, #tpu.memory_space<vmem>>, vector<32x32xbf16>
    %cst_9 = arith.constant dense<0.000000e+00> : vector<1x32xf32>
    %9 = tpu.matmul %5, %8, %cst_9 {dimension_numbers = #tpu.dot_dimension_numbers<[1], [0], [0], [1], [0, 0, 1, 1], [], []>} : vector<1x32xbf16>, vector<32x32xbf16>, vector<1x32xf32> -> vector<1x32xf32>
    %10 = vector.broadcast %9 : vector<1x32xf32> to vector<8x32xf32>
    %11 = arith.addf %7, %10 : vector<8x32xf32>
    %c0_10 = arith.constant 0 : index
    %c0_11 = arith.constant 0 : index
    %12 = vector.load %arg6[%c0_10, %c0_11] : memref<1x32xf32, #tpu.memory_space<vmem>>, vector<1x32xf32>
    %13 = vector.broadcast %12 : vector<1x32xf32> to vector<8x32xf32>
    %14 = arith.addf %11, %13 : vector<8x32xf32>
    %15 = math.tanh %14 : vector<8x32xf32>
    %cst_12 = arith.constant dense<0.000000e+00> : vector<8xf32>
    %16 = vector.multi_reduction <add>, %15, %cst_12 [1] : vector<8x32xf32> to vector<8xf32>
    %17 = vector.shape_cast %16 : vector<8xf32> to vector<8x1xf32>
    %cst_13 = arith.constant 3.200000e+01 : f32
    %18 = vector.broadcast %cst_13 : f32 to vector<8x1xf32>
    %19 = arith.divf %17, %18 : vector<8x1xf32>
    %20 = vector.broadcast %19 : vector<8x1xf32> to vector<8x32xf32>
    %21 = arith.subf %15, %20 : vector<8x32xf32>
    %22 = arith.mulf %21, %21 : vector<8x32xf32>
    %cst_14 = arith.constant dense<0.000000e+00> : vector<8xf32>
    %23 = vector.multi_reduction <add>, %22, %cst_14 [1] : vector<8x32xf32> to vector<8xf32>
    %24 = vector.shape_cast %23 : vector<8xf32> to vector<8x1xf32>
    %cst_15 = arith.constant 3.200000e+01 : f32
    %25 = vector.broadcast %cst_15 : f32 to vector<8x1xf32>
    %26 = arith.divf %24, %25 : vector<8x1xf32>
    %27 = vector.broadcast %19 : vector<8x1xf32> to vector<8x32xf32>
    %28 = arith.subf %15, %27 : vector<8x32xf32>
    %cst_16 = arith.constant 9.99999996E-13 : f32
    %29 = vector.broadcast %cst_16 : f32 to vector<8x1xf32>
    %30 = arith.addf %26, %29 : vector<8x1xf32>
    %31 = math.rsqrt %30 : vector<8x1xf32>
    %32 = vector.broadcast %31 : vector<8x1xf32> to vector<8x32xf32>
    %33 = arith.mulf %28, %32 : vector<8x32xf32>
    %c0_17 = arith.constant 0 : index
    %c0_18 = arith.constant 0 : index
    %34 = vector.load %arg7[%c0_17, %c0_18] : memref<1x32xf32, #tpu.memory_space<vmem>>, vector<1x32xf32>
    %35 = vector.broadcast %34 : vector<1x32xf32> to vector<8x32xf32>
    %36 = arith.mulf %33, %35 : vector<8x32xf32>
    %cst_19 = arith.constant dense<0.000000e+00> : vector<8xf32>
    %37 = vector.multi_reduction <add>, %36, %cst_19 [1] : vector<8x32xf32> to vector<8xf32>
    %38 = vector.shape_cast %37 : vector<8xf32> to vector<8x1xf32>
    %c0_20 = arith.constant 0 : index
    %c0_21 = arith.constant 0 : index
    %39 = vector.load %arg8[%c0_20, %c0_21] : memref<1x1xf32, #tpu.memory_space<vmem>>, vector<1x1xf32>
    %40 = vector.extract %39[0, 0] : f32 from vector<1x1xf32>
    %41 = vector.broadcast %40 : f32 to vector<8x1xf32>
    %42 = arith.addf %38, %41 : vector<8x1xf32>
    %c0_22 = arith.constant 0 : index
    %c0_23 = arith.constant 0 : index
    %c0_24 = arith.constant 0 : index
    %43 = vector.load %arg9[%c0_22, %c0_23, %c0_24] : memref<1x8x1xf32, #tpu.memory_space<vmem>>, vector<1x8x1xf32>
    %44 = vector.shape_cast %43 : vector<1x8x1xf32> to vector<8x1xf32>
    %45 = vector.shape_cast %42 : vector<8x1xf32> to vector<1x8x1xf32>
    tpu.vector_store %arg9[%c0_22, %c0_23, %c0_24], %45 {strides = array<i32>} : memref<1x8x1xf32, #tpu.memory_space<vmem>>, vector<1x8x1xf32>,
    return
  }
  func.func @transform_0(%arg0: i32, %arg1: i32) -> (i32, i32, i32) {
    %c0_i32 = arith.constant 0 : i32
    %c0_i32_0 = arith.constant 0 : i32
    return %arg0, %arg1, %c0_i32 : i32, i32, i32
  }
  func.func @transform_1(%arg0: i32, %arg1: i32) -> (i32, i32, i32) {
    %c0_i32 = arith.constant 0 : i32
    %c0_i32_0 = arith.constant 0 : i32
    %c0_i32_1 = arith.constant 0 : i32
    return %arg0, %c0_i32, %c0_i32_0 : i32, i32, i32
  }
  func.func @transform_2(%arg0: i32, %arg1: i32) -> (i32, i32) {
    %c0_i32 = arith.constant 0 : i32
    %c0_i32_0 = arith.constant 0 : i32
    %c0_i32_1 = arith.constant 0 : i32
    return %c0_i32, %c0_i32_0 : i32, i32
  }
  func.func @transform_3(%arg0: i32, %arg1: i32) -> (i32, i32) {
    %c0_i32 = arith.constant 0 : i32
    %c0_i32_0 = arith.constant 0 : i32
    %c0_i32_1 = arith.constant 0 : i32
    return %c0_i32, %c0_i32_0 : i32, i32
  }
  func.func @transform_4(%arg0: i32, %arg1: i32) -> (i32, i32) {
    %c0_i32 = arith.constant 0 : i32
    %c0_i32_0 = arith.constant 0 : i32
    %c0_i32_1 = arith.constant 0 : i32
    return %c0_i32, %c0_i32_0 : i32, i32
  }
  func.func @transform_5(%arg0: i32, %arg1: i32) -> (i32, i32) {
    %c0_i32 = arith.constant 0 : i32
    %c0_i32_0 = arith.constant 0 : i32
    %c0_i32_1 = arith.constant 0 : i32
    return %c0_i32, %c0_i32_0 : i32, i32
  }
  func.func @transform_6(%arg0: i32, %arg1: i32) -> (i32, i32) {
    %c0_i32 = arith.constant 0 : i32
    %c0_i32_0 = arith.constant 0 : i32
    %c0_i32_1 = arith.constant 0 : i32
    return %c0_i32, %c0_i32_0 : i32, i32
  }
  func.func @transform_7(%arg0: i32, %arg1: i32) -> (i32, i32, i32) {
    %c0_i32 = arith.constant 0 : i32
    %c0_i32_0 = arith.constant 0 : i32
    return %arg0, %arg1, %c0_i32 : i32, i32, i32
  }
}

</mosaic_0001>

<bundles_post_ra>
// kernel: tpu_custom_call.1
= control target key start
LH: loop header
LB: loop body
LE: loop exit
PB: predicated region body
PF: predicated region fallthrough
CT: control target
= control target key end

     0   :  { %s1565_s0 = inlined_call_operand.hbm [shape: f32[2,8,32], index: 0, kind: input, shape index: {}]   ;;  %s1566_s1 = inlined_call_operand.hbm [shape: f32[2,1,32], index: 1, kind: input, shape index: {}]   ;;  %s1567_s2 = inlined_call_operand.hbm [shape: bf16[32,32], index: 2, kind: input, shape index: {}]   ;;  %s1568_s3 = inlined_call_operand.hbm [shape: bf16[32,32], index: 3, kind: input, shape index: {}]   ;;  %s1569_s4 = inlined_call_operand.hbm [shape: f32[1,32], index: 4, kind: input, shape index: {}]   ;;  %s1570_s5 = inlined_call_operand.hbm [shape: f32[1,32], index: 5, kind: input, shape index: {}]   ;;  %s1571_s6 = inlined_call_operand.<no memory space> [shape: f32[1,1], index: 6, kind: input, shape index: {}]   ;;  %s1572_s7 = inlined_call_operand.hbm [shape: f32[2,8,1], index: 7, kind: output, shape index: {}]  }
   0x1   :  { %1577 = sst [smem:[#allocation21_spill]] %s1565_s0  ;;  %v12_v0 = vstv %s1571_s6 }
   0x2   :  { %1578 = sst [smem:[#allocation22_spill]] %s1567_s2  ;;  %13 = vst [vmem:[#allocation2] sm:$0x1] %v12_v0 }
   0x3   :  { %1579 = sst [smem:[#allocation23_spill]] %s1568_s3 }
   0x4   :  { %14 = vsyncpa [#allocation4], 0 }
   0x5   :  { %16 = vsyncpa [#allocation4 + $0x1], 0 }
   0x6   :  { %17 = vsyncpa [#allocation7], 0 }
   0x7   :  { %19 = vsyncpa [#allocation7 + $0x1], 0 }
   0x8   :  { %20 = vsyncpa [#allocation10], 0 }
   0x9   :  { %21 = vsyncpa [#allocation13], 0 }
   0xa   :  { %22 = vsyncpa [#allocation5], 0 }
   0xb   :  { %24 = vsyncpa [#allocation5 + $0x1], 0  ;;  %s1222_s26 = smov 0   ;;  %s1224_s27 = smov 0  }
   0xc   :  { %s1226_s28 = smov 0   ;;  %s1228_s29 = smov 0  }
   0xd   :  { %s1230_s30 = smov 0   ;;  %s1232_s6 = smov 0  }
   0xe LB: > { %s1253_s8 = sadd.s32 4294967295, %s1166_s6   ;;  %p724_p0 = scmp.ge.s32.totalorder %s1166_s6, 1  ;;  %s1166_s6 = sphi %s1232_s6, %s30_s6   ;;  %s1162_s30 = sphi %s1230_s30, %s1608_s30   ;;  %s1158_s29 = sphi %s1228_s29, %s1607_s29   ;;  %s1154_s28 = sphi %s1226_s28, %s1606_s28   ;;  %s1150_s27 = sphi %s1224_s27, %s1605_s27   ;;  %s1146_s26 = sphi %s1222_s26, %s1604_s26  }
   0xf   : > { %p1573_p1 = scmp.eq.s32.totalorder %s1253_s8, 0  ;;  %p234_p2 = scmp.lt.s32.totalorder %s1166_s6, 3 }
  0x10   : > { %s1168_s10 = smov [#allocation8]   ;;  %s1169_s13 = smov [#allocation9]  }
  0x11   : > { %p1258_p3 = pnand %p724_p0, %p234_p2  ;;  %s246_s11 = sshll.u32 %s1168_s10, 4  ;;  %s1262_s11 = int_to_ptr.vmem [resolvable:$true] %s246_s11 }
  0x12   : > { %s259_s14 = sshll.u32 %s1169_s13, 4  ;;  %s1170_s15 = smov [#allocation11]   ;;  %s1273_s14 = int_to_ptr.vmem [resolvable:$true] %s259_s14 }
  0x13   : > { %s1580_s9 = scalar_select %p1258_p3, 1, 0 }
  0x14   : > { %p798_p4 = pneg %p1258_p3  ;;  %s1275_s16 = sshll.u32 %s1170_s15, 4  ;;  %s274_s16 = int_to_ptr.vmem [resolvable:$true] %s1275_s16 }
  0x15   : > { %s1582_s2 = sld [smem:[#allocation22_spill]] }
  0x16   : > { %p1269_p6 = pnand %p798_p4, %p1573_p1 }
  0x18   : > { %p1285_p8 = pneg %p1269_p6 }
  0x1b   : > { %s896_s19 = scalar_lea.hbm %s1582_s2, 256 }
  0x1c   : > { %p897_p7 = scmp.ne.s32.totalorder %s1582_s2, %s896_s19  ;;  %p903_p11 = scmp.lt.u32.totalorder %s896_s19, %s1582_s2 }
  0x1e   : > { %p899_p9 = pnand %p1285_p8, %p897_p7 }
  0x20   : > { %p900_p10 = pneg %p899_p9 }
  0x22   : > { %p905_p12 = pnand %p903_p11, %p900_p10 }
  0x24   : > { %908 = shalt.err (!%p905_p12)
}
  0x25   : > { %s909_s25 = scalar_lea.vmem %s1262_s11, 256  ;;  %p917_p4 = scmp.lt.s32.totalorder %s1262_s11, %s1262_s11 }
  0x26   : > { %p910_p13 = scmp.ne.s32.totalorder %s1262_s11, %s909_s25  ;;  %p918_p5 = scmp.lt.s32.totalorder %s909_s25, %s909_s25 }
  0x28   : > { %p912_p0 = pnand %p910_p13, %p1285_p8  ;;  %p919_p7 = por %p918_p5, %p917_p4 }
  0x2a   : > { %p913_p2 = pneg %p912_p0 }
  0x2c   : > { %p920_p9 = pnand %p919_p7, %p913_p2 }
  0x2e   : > { %923 = shalt.err (!%p920_p9)
}
  0x2f   : > { %s1171_s10 = smov 64   ;;  %s1172_s13 = smov 4  }
  0x30   : > { %801 = dma.hbm_to_vmem [thread:$0]  (!%p1269_p6), %s1582_s2, 256, %s1262_s11, [#allocation7], %s1171_s10, %s1171_s10, %s1172_s13  }
  0x31   : > { %s1584_s3 = sld [smem:[#allocation23_spill]] }
  0x37   : > { %s924_s20 = scalar_lea.hbm %s1584_s3, 256 }
  0x38   : > { %p925_p5 = scmp.ne.s32.totalorder %s1584_s3, %s924_s20  ;;  %p931_p12 = scmp.lt.u32.totalorder %s924_s20, %s1584_s3 }
  0x3a   : > { %p927_p10 = pnand %p925_p5, %p1285_p8 }
  0x3c   : > { %p928_p11 = pneg %p927_p10 }
  0x3e   : > { %p933_p13 = pnand %p931_p12, %p928_p11 }
  0x40   : > { %936 = shalt.err (!%p933_p13)
}
  0x41   : > { %s937_s11 = scalar_lea.vmem %s1273_s14, 256  ;;  %p945_p7 = scmp.lt.s32.totalorder %s1273_s14, %s1273_s14 }
  0x42   : > { %p938_p0 = scmp.ne.s32.totalorder %s1273_s14, %s937_s11  ;;  %p946_p9 = scmp.lt.s32.totalorder %s937_s11, %s937_s11 }
  0x44   : > { %p940_p2 = pnand %p938_p0, %p1285_p8  ;;  %p947_p5 = por %p946_p9, %p945_p7 }
  0x46   : > { %p941_p4 = pneg %p940_p2 }
  0x48   : > { %p948_p10 = pnand %p947_p5, %p941_p4 }
  0x4a   : > { %951 = shalt.err (!%p948_p10)
}
  0x4b   : > { %804 = dma.hbm_to_vmem [thread:$0]  (!%p1269_p6), %s1584_s3, 256, %s1273_s14, [#allocation10], %s1171_s10, %s1171_s10, %s1172_s13  }
  0x4c   : > { %s952_s20 = scalar_lea.hbm %s1569_s4, 16 }
  0x4d   : > { %p953_p11 = scmp.ne.s32.totalorder %s1569_s4, %s952_s20  ;;  %p959_p0 = scmp.lt.u32.totalorder %s952_s20, %s1569_s4 }
  0x4f   : > { %p955_p12 = pnand %p953_p11, %p1285_p8 }
  0x51   : > { %p956_p13 = pneg %p955_p12 }
  0x53   : > { %p961_p2 = pnand %p959_p0, %p956_p13 }
  0x55   : > { %964 = shalt.err (!%p961_p2)
}
  0x56   : > { %s965_s11 = scalar_lea.vmem %s274_s16, 16  ;;  %s972_s14 = scalar_lea.vmem %s274_s16, 32 }
  0x57   : > { %p966_p4 = scmp.ne.s32.totalorder %s274_s16, %s965_s11  ;;  %p973_p5 = scmp.lt.s32.totalorder %s274_s16, %s274_s16 }
  0x58   : > { %p974_p10 = scmp.lt.s32.totalorder %s972_s14, %s965_s11 }
  0x59   : > { %p968_p7 = pnand %p966_p4, %p1285_p8 }
  0x5a   : > { %p975_p1 = por %p974_p10, %p973_p5 }
  0x5b   : > { %p969_p9 = pneg %p968_p7 }
  0x5d   : > { %p976_p3 = pnand %p975_p1, %p969_p9 }
  0x5f   : > { %979 = shalt.err (!%p976_p3)
}
  0x60   : > { %807 = dma.hbm_to_vmem [thread:$0]  (!%p1269_p6), %s1569_s4, 16, %s274_s16, [#allocation10]  }
  0x61   : > { %s1173_s15 = smov [#allocation12]   ;;  %s980_s20 = scalar_lea.hbm %s1570_s5, 16 }
  0x62   : > { %s284_s17 = sshll.u32 %s1173_s15, 4  ;;  %p981_p11 = scmp.ne.s32.totalorder %s1570_s5, %s980_s20  ;;  %s285_s17 = int_to_ptr.vmem [resolvable:$true] %s284_s17 }
  0x63   : > { %p987_p12 = scmp.lt.u32.totalorder %s980_s20, %s1570_s5 }
  0x64   : > { %p983_p1 = pnand %p981_p11, %p1285_p8 }
  0x66   : > { %p984_p3 = pneg %p983_p1 }
  0x68   : > { %p989_p13 = pnand %p987_p12, %p984_p3 }
  0x6a   : > { %992 = shalt.err (!%p989_p13)
}
  0x6b   : > { %s993_s16 = scalar_lea.vmem %s285_s17, 16  ;;  %s1000_s11 = scalar_lea.vmem %s285_s17, 32 }
  0x6c   : > { %p994_p0 = scmp.ne.s32.totalorder %s285_s17, %s993_s16  ;;  %p1001_p7 = scmp.lt.s32.totalorder %s285_s17, %s285_s17 }
  0x6d   : > { %p1002_p9 = scmp.lt.s32.totalorder %s1000_s11, %s993_s16 }
  0x6e   : > { %p996_p2 = pnand %p994_p0, %p1285_p8 }
  0x6f   : > { %p1003_p5 = por %p1002_p9, %p1001_p7 }
  0x70   : > { %p997_p4 = pneg %p996_p2 }
  0x72   : > { %p1004_p10 = pnand %p1003_p5, %p997_p4 }
  0x74   : > { %1007 = shalt.err (!%p1004_p10)
}
  0x75   : > { %810 = dma.hbm_to_vmem [thread:$0]  (!%p1269_p6), %s1570_s5, 16, %s285_s17, [#allocation13]  }
  0x76   : > { %s723_s22 = sadd.s32 4294967294, %s1166_s6   ;;  %s42_s13 = sadd.s32 1, %s1162_s30 }
  0x77   : > { %p44_p8 = scmp.ge.s32.totalorder %s42_s13, 2  ;;  %s51_s12 = sadd.s32 1, %s1154_s28 }
  0x78   : > { %p58_p11 = scmp.ne.s32.totalorder %s1154_s28, %s1150_s27  ;;  %p59_p1 = scmp.eq.s32.totalorder %s1166_s6, 0 }
  0x79   : > { %s1610_s13 = smov (%p44_p8, %s42_s13), 0  ;;  %p64_p12 = scmp.ne.s32.totalorder %s1150_s27, %s1146_s26 }
  0x7a   : > { %p1374_p3 = por %p59_p1, %p58_p11  ;;  %s46_s17 = ssub.s32 %s1162_s30, %s1610_s13 }
  0x7b   : > { %p221_p6 = scmp.eq.s32.totalorder %s1253_s8, 1  ;;  %p49_p13 = scmp.eq.s32.totalorder %s46_s17, 0 }
  0x7c   : > { %p1586_p0 = scmp.eq.s32.totalorder %s1253_s8, 0  ;;  %p227_p7 = scmp.eq.s32.totalorder %s723_s22, 1 }
  0x7d   : > { %p1389_p4 = por %p221_p6, %p58_p11  ;;  %p826_p5 = scmp.lt.s32.totalorder %s1166_s6, 2 }
  0x7e   : > { %p1385_p2 = por %p1586_p0, %p64_p12  ;;  %p1396_p9 = por %p227_p7, %p64_p12 }
  0x7f   : > { %s1588_s19 = scalar_select %p1389_p4, 1, 0 }
  0x80   : > { %s1587_s18 = scalar_select %p1385_p2, 1, 0 }
  0x81   : > { %s1394_s20 = scalar_select %p49_p13, %s1154_s28, %s51_s12  }
  0x82   : > { %s1589_s21 = scalar_select %p1396_p9, 1, 0 }
  0x83   : > { %s1402_s23 = sand.u32 1, %s1154_s28   ;;  %s731_s24 = sshll.u32 %s1162_s30, 7 }
  0x84   : > { %s730_s25 = sshll.u32 %s1402_s23, 3  ;;  %s1590_s0 = sld [smem:[#allocation21_spill]] }
  0x85   : > { %s302_s10 = scalar_lea.vmem [#allocation3], %s730_s25  ;;  %p1413_p10 = pnand %p826_p5, %p1374_p3 }
  0x86   : > { %s310_s22 = sshll.u32 %s302_s10, 4  ;;  %s299_s2 = scalar_lea.sflag [#allocation4], %s1402_s23  ;;  %s1417_s22 = int_to_ptr.vmem [resolvable:$true] %s310_s22 }
  0x87   : > { %p1010_p11 = pneg %p1413_p10 }
  0x8a   : > { %s1409_s14 = scalar_lea.hbm %s1590_s0, %s731_s24  ;;  %s1013_s25 = scalar_lea.hbm %s1590_s0, 256 }
  0x8b   : > { %s1008_s16 = scalar_lea.hbm %s1409_s14, 128  ;;  %p1014_p3 = scmp.lt.u32.totalorder %s1409_s14, %s1590_s0 }
  0x8c   : > { %p1009_p8 = scmp.ne.s32.totalorder %s1409_s14, %s1008_s16  ;;  %p1015_p6 = scmp.lt.u32.totalorder %s1013_s25, %s1008_s16 }
  0x8d   : > { %p1017_p0 = scmp.lt.u32.totalorder %s1008_s16, %s1409_s14 }
  0x8e   : > { %p1011_p1 = pnand %p1010_p11, %p1009_p8  ;;  %p1016_p13 = por %p1015_p6, %p1014_p3 }
  0x90   : > { %p1012_p12 = pneg %p1011_p1  ;;  %p1018_p7 = por %p1017_p0, %p1016_p13 }
  0x92   : > { %p1019_p5 = pnand %p1018_p7, %p1012_p12 }
  0x94   : > { %1022 = shalt.err (!%p1019_p5)
}
  0x95   : > { %s1023_s17 = scalar_lea.vmem %s1417_s22, 128  ;;  %s1174_s24 = smov [#allocation3]  }
  0x96   : > { %p1024_p8 = scmp.ne.s32.totalorder %s1417_s22, %s1023_s17  ;;  %s1028_s15 = sshll.u32 %s1174_s24, 4  ;;  %s1029_s15 = int_to_ptr.vmem [resolvable:$false] %s1028_s15 }
  0x97   : > { %s1030_s11 = scalar_lea.vmem %s1029_s15, 256  ;;  %p1031_p4 = scmp.lt.s32.totalorder %s1417_s22, %s1029_s15 }
  0x98   : > { %p1026_p1 = pnand %p1024_p8, %p1010_p11  ;;  %p1032_p3 = scmp.lt.s32.totalorder %s1030_s11, %s1023_s17 }
  0x9a   : > { %p1027_p9 = pneg %p1026_p1  ;;  %p1033_p6 = por %p1032_p3, %p1031_p4 }
  0x9c   : > { %p1034_p13 = pnand %p1033_p6, %p1027_p9 }
  0x9e   : > { %1037 = shalt.err (!%p1034_p13)
}
  0x9f   : > { %814 = dma.hbm_to_vmem [thread:$0]  (!%p1413_p10), %s1409_s14, 128, %s1417_s22, %s299_s2  }
  0xa0   : > { %s732_s16 = sshll.u32 %s1162_s30, 4  ;;  %s320_s17 = scalar_lea.vmem [#allocation6], %s1402_s23 }
  0xa1   : > { %s1450_s24 = scalar_lea.hbm %s1566_s1, %s732_s16  ;;  %s327_s15 = sshll.u32 %s320_s17, 4  ;;  %s328_s15 = int_to_ptr.vmem [resolvable:$true] %s327_s15 }
  0xa2   : > { %s1592_s11 = sand.u32 1, %s1166_s6   ;;  %s1038_s3 = scalar_lea.hbm %s1450_s24, 16 }
  0xa3   : > { %s318_s0 = scalar_lea.sflag [#allocation7], %s1592_s11  ;;  %p1039_p4 = scmp.ne.s32.totalorder %s1450_s24, %s1038_s3 }
  0xa4   : > { %s1043_s22 = scalar_lea.hbm %s1566_s1, 32  ;;  %p1044_p0 = scmp.lt.u32.totalorder %s1450_s24, %s1566_s1 }
  0xa5   : > { %p1041_p9 = pnand %p1039_p4, %p1010_p11  ;;  %p1045_p7 = scmp.lt.u32.totalorder %s1043_s22, %s1038_s3 }
  0xa6   : > { %p1047_p8 = scmp.lt.u32.totalorder %s1038_s3, %s1450_s24 }
  0xa7   : > { %p1042_p12 = pneg %p1041_p9  ;;  %p1046_p5 = por %p1045_p7, %p1044_p0 }
  0xa9   : > { %p1048_p1 = por %p1047_p8, %p1046_p5 }
  0xab   : > { %p1049_p3 = pnand %p1048_p1, %p1042_p12 }
  0xad   : > { %1052 = shalt.err (!%p1049_p3)
}
  0xae   : > { %s1053_s23 = scalar_lea.vmem %s328_s15, 16  ;;  %s1175_s10 = smov [#allocation6]  }
  0xaf   : > { %p1054_p6 = scmp.ne.s32.totalorder %s328_s15, %s1053_s23  ;;  %s1058_s17 = sshll.u32 %s1175_s10, 4  ;;  %s1059_s17 = int_to_ptr.vmem [resolvable:$false] %s1058_s17 }
  0xb0   : > { %s1060_s11 = scalar_lea.vmem %s1059_s17, 32  ;;  %p1061_p9 = scmp.lt.s32.totalorder %s328_s15, %s1059_s17 }
  0xb1   : > { %p1056_p13 = pnand %p1054_p6, %p1010_p11  ;;  %p1062_p2 = scmp.lt.s32.totalorder %s1060_s11, %s1053_s23 }
  0xb3   : > { %p1057_p4 = pneg %p1056_p13  ;;  %p1063_p0 = por %p1062_p2, %p1061_p9 }
  0xb5   : > { %p1064_p7 = pnand %p1063_p0, %p1057_p4 }
  0xb7   : > { %1067 = shalt.err (!%p1064_p7)
}
  0xb8   : > { %817 = dma.hbm_to_vmem [thread:$0]  (!%p1413_p10), %s1450_s24, 16, %s328_s15, %s318_s0  }
  0xb9   : > { %p1593_p12 = scmp.ne.s32.totalorder %s1580_s9, 0 }
  0xba   : > { %s1477_s3 = sand.u32 (!%p1593_p12), 1, %s1150_s27   ;;  %p1594_p2 = scmp.ne.s32.totalorder (!%p1593_p12), %s1587_s18, 0 }
  0xbb   : > { %336 = sbr.rel (%p1593_p12) target bundleno = 916 (0x394), region = 48  ;;  %s734_s2 = sshll.u32 (!%p1593_p12), %s1477_s3, 3 }
  0xbc   : > { %s339_s14 = scalar_lea.sflag (!%p1593_p12), [#allocation4], %s1477_s3  ;;  %s342_s22 = scalar_lea.vmem (!%p1593_p12), [#allocation3], %s734_s2 }
  0xc2   : > { %1121 = dma.done.wait (%p1594_p2), %s339_s14, 128  }
  0xc3   : > { %1123 = vsyncadd (%p1594_p2), %s339_s14, 4294967168  ;;  %s347_s0 = sand.u32 1, %s1253_s8   ;;  %s350_s12 = scalar_lea.vmem [#allocation6], %s1477_s3 }
  0xc4   : > { %s348_s9 = scalar_lea.sflag [#allocation7], %s347_s0 }
  0xc5   : > { %1125 = dma.done.wait (%p1594_p2), %s348_s9, 16  }
  0xc6   : > { %1127 = vsyncadd (%p1594_p2), %s348_s9, 4294967280  ;;  %p1595_p10 = scmp.eq.s32.totalorder %s1253_s8, 0 }
  0xc8   : > { %1129 = dma.done.wait (%p1595_p10), [#allocation7], 256   ;;  %p1596_p11 = pmov %p1595_p10 }
  0xc9   : > { %p1597_p5 = pmov %p1595_p10 }
  0xca   : > { %1131 = vsyncadd (%p1596_p11), [#allocation7], 4294967040 }
  0xcb   : > { %1133 = dma.done.wait (%p1597_p5), [#allocation10], 272   ;;  %p1598_p8 = pmov %p1597_p5 }
  0xcc   : > { %p1599_p1 = pmov %p1597_p5 }
  0xcd   : > { %1135 = vsyncadd (%p1598_p8), [#allocation10], 4294967024 }
  0xce   : > { %1137 = dma.done.wait (%p1599_p1), [#allocation13], 16   ;;  %p1600_p3 = pmov %p1599_p1 }
  0xcf   : > { %v1176_v1 = vmov 0.0   ;;  %vm1177_vm0 = vmmov 0   ;;  %v888_v2 = vld [vmem:[#allocation9] sm:$0xff]   ;;  %v889_v3 = vld [vmem:[#allocation8] sm:$0xff]   ;;  %v890_v4 = vld [vmem:[#allocation9 + $0x8] sm:$0xff]   ;;  %vm426_vm1 = vcmask 261120   ;;  %v470_v10 = vlaneseq }
  0xd0   : > { %1139 = vsyncadd (%p1600_p3), [#allocation13], 4294967280  ;;  %758 = vmatprep.subr.bf16.mxu0 %v1176_v1  ;;  %766 = vmatprep.subr.bf16.mxu1 %v1176_v1  ;;  %v891_v5 = vld [vmem:[#allocation8 + $0x8] sm:$0xff]   ;;  %v746_v17 = vld [vmem:[#allocation11] ss:$0 sm:$0xff]  ;;  %s749_s18 = sshll.u32 %s1158_s29, 7 }
  0xd1   : > { %762 = vmatprep.mubr.msk.bf16.mxu0 %vm1177_vm0, %v1176_v1  ;;  %770 = vmatprep.mubr.msk.bf16.mxu1 %vm1177_vm0, %v1176_v1  ;;  %v404_v6 = vld [vmem:[%s350_s12] sm:$0x1]  ;;  %v402_v7 = vld [vmem:[%s342_s22] sm:$0xff]  ;;  %v471_v11 = vshrl.u32 %v470_v10, 7  ;;  %v747_v37 = vld [vmem:[#allocation12] ss:$0 sm:$0xff]  ;;  %s1516_s23 = scalar_lea.hbm %s1572_s7, %s749_s18 }
  0xd2   : > { %759 = vmatpush3.bf16.msra.mxu0 %v888_v2  ;;  %767 = vmatpush3.bf16.msra.mxu1 %v889_v3  ;;  %v405_v8 = vpack.c.bf16 %v404_v6, %v404_v6  ;;  %v403_v9 = vpack.c.bf16 %v402_v7, %v402_v7  ;;  %v563_v32 = vld [vmem:[#allocation2] sm:$0x1]  ;;  %s400_s24 = scalar_lea.vmem [#allocation14], %s734_s2  ;;  %vm567_vm2 = vcmask 7168   ;;  %s570_s10 = scalar_lea.sflag [#allocation5], %s1477_s3 }
  0xd3   : > { %760 = vmatprep.subr.bf16.mxu0 %v1176_v1  ;;  %768 = vmatprep.subr.bf16.mxu1 %v1176_v1  ;;  %v472_v12 = vsub.s32 0, %v471_v11  ;;  %774 = vpush %v563_v32  ;;  %s584_s15 = sshll.u32 %s400_s24, 4  ;;  %p1601_p13 = scmp.ne.s32.totalorder %s1588_s19, 0  ;;  %s1518_s15 = int_to_ptr.vmem [resolvable:$true] %s584_s15 }
  0xd4   : > { %s1068_s17 = scalar_lea.vmem %s1518_s15, 128  ;;  %s1178_s29 = smov [#allocation14]  }
  0xd5   : > { %p1069_p6 = scmp.ne.s32.totalorder %s1518_s15, %s1068_s17  ;;  %s1072_s11 = sshll.u32 %s1178_s29, 4  ;;  %s1073_s11 = int_to_ptr.vmem [resolvable:$false] %s1072_s11 }
  0xd6   : > { %761 = vmatpush3.bf16.msra.mxu0 %v890_v4  ;;  %769 = vmatpush3.bf16.msra.mxu1 %v891_v5  ;;  %s1074_s2 = scalar_lea.vmem %s1073_s11, 256  ;;  %p1075_p0 = scmp.lt.s32.totalorder %s1518_s15, %s1073_s11 }
  0xd7   : > { %p1070_p4 = pnand %p1069_p6, %p1601_p13  ;;  %p1076_p7 = scmp.lt.s32.totalorder %s1074_s2, %s1068_s17 }
  0xd9   : > { %763 = vmatmul.mubr.msk.bf16.vlgmr.msra.gmra.mrb[0].mxu0 %vm426_vm1, %v405_v8  ;;  %771 = vmatmul.mubr.msk.bf16.vlgmr.msra.gmra.mrb[0].mxu1 %vm426_vm1, %v403_v9  ;;  %p1071_p9 = pneg %p1070_p4  ;;  %p1077_p12 = por %p1076_p7, %p1075_p0 }
  0xdb   : > { %p1078_p2 = pnand %p1077_p12, %p1071_p9 }
 0x104   : > { %s775_s8 = spop %774 }
 0x105   : > { %v565_v41 = vstv %s775_s8 }
 0x1ac   : > { %v464_v13 = vpop.f32.mrb[0].mxu0  ;;  %v523_v15 = vpop.f32.mrb[0].mxu1 }
 0x1ad   : > { %v473_v14 = vrot.slane %v464_v13, %v472_v12  ;;  %v764_v16 = vpop.f32.mrb[1].mxu0  ;;  %v772_v18 = vpop.f32.mrb[1].mxu1 }
 0x1ae   : > { %v467_v19 = vpop.f32.mrb[2].mxu0  ;;  %v526_v21 = vpop.f32.mrb[2].mxu1 }
 0x1af   : > { %v524_v20 = vadd.f32 %v523_v15, %v473_v14  ;;  %v765_v22 = vpop.f32.mrb[3].mxu0  ;;  %v773_v23 = vpop.f32.mrb[3].mxu1 }
 0x1b1   : > { %v536_v24 = vadd.f32 %v746_v17, %v524_v20 }
 0x1b3   : > { %892 = vtanh.f32 %v536_v24 }
 0x1bd   : > { %v893_v25 = vpop.eup %892 }
 0x1be   : > { %v538_v26 = vsel %vm426_vm1, %v893_v25, 0.0 }
 0x1bf   : > { %539 = vadd.xlane.f32.xlu0 %v538_v26 }
 0x24c   : > { %v540_v27 = vpop.xlane.xlu0 %539 }
 0x24d   : > { %v542_v28 = vmul.f32 0.03125, %v540_v27 }
 0x24f   : > { %v543_v29 = vsub.f32 %v893_v25, %v542_v28 }
 0x251   : > { %v544_v30 = vmul.f32 %v543_v29, %v543_v29 }
 0x253   : > { %v545_v31 = vsel %vm426_vm1, %v544_v30, 0.0 }
 0x254   : > { %546 = vadd.xlane.f32.xlu0 %v545_v31 }
 0x2e1   : > { %v547_v33 = vpop.xlane.xlu0 %546 }
 0x2e2   : > { %v548_v34 = vmul.f32 0.03125, %v547_v33 }
 0x2e4   : > { %v549_v35 = vadd.f32 1e-12, %v548_v34 }
 0x2e6   : > { %894 = vrsqrt.f32 %v549_v35 }
 0x2f0   : > { %v895_v36 = vpop.eup %894 }
 0x2f1   : > { %v551_v38 = vmul.f32 %v895_v36, %v543_v29 }
 0x2f3   : > { %v559_v39 = vmul.f32 %v747_v37, %v551_v38 }
 0x2f5   : > { %v560_v40 = vsel %vm426_vm1, %v559_v39, 0.0 }
 0x2f6   : > { %561 = vadd.xlane.f32.xlu1 %v560_v40 }
 0x383   : > { %v562_v42 = vpop.xlane.xlu1 %561 }
 0x384   : > { %v566_v43 = vadd.f32 %v565_v41, %v562_v42 }
 0x386   : > { %568 = vst.msk [vmem:[%s400_s24] sm:$0xff] %vm567_vm2, %v566_v43 }
 0x387   : > { %1081 = shalt.err (!%p1078_p2)
}
 0x388   : > { %s1082_s3 = scalar_lea.hbm %s1516_s23, 128  ;;  %s1086_s0 = scalar_lea.hbm %s1572_s7, 256 }
 0x389   : > { %p1083_p10 = scmp.ne.s32.totalorder %s1516_s23, %s1082_s3  ;;  %p1087_p8 = scmp.lt.u32.totalorder %s1516_s23, %s1572_s7 }
 0x38a   : > { %p1088_p1 = scmp.lt.u32.totalorder %s1086_s0, %s1082_s3  ;;  %p1090_p6 = scmp.lt.u32.totalorder %s1082_s3, %s1516_s23 }
 0x38b   : > { %p1084_p11 = pnand %p1083_p10, %p1601_p13 }
 0x38c   : > { %p1089_p3 = por %p1088_p1, %p1087_p8 }
 0x38d   : > { %p1085_p5 = pneg %p1084_p11 }
 0x38e   : > { %p1091_p4 = por %p1090_p6, %p1089_p3 }
 0x390   : > { %p1092_p9 = pnand %p1091_p4, %p1085_p5 }
 0x392   : > { %1095 = shalt.err (!%p1092_p9)
}
 0x393   : > { %796 = dma.vmem_to_hbm [thread:$0]  (%p1601_p13), %s1518_s15, 128, %s1516_s23, %s570_s10  }
 0x394 PF: > { %s596_s8 = sand.u32 1, %s1146_s26   ;;  %p1602_p0 = scmp.ne.s32.totalorder %s1589_s21, 0 }
 0x395   : > { %p1603_p7 = scmp.ge.s32.totalorder %s1166_s6, 2  ;;  %s597_s18 = scalar_lea.sflag [#allocation5], %s596_s8 }
 0x397   : > { %p819_p12 = pnand %p1603_p7, %p1602_p0 }
 0x399   : > { %1141 = dma.done.wait (!%p819_p12), %s597_s18, 128  }
 0x39a   : > { %1143 = vsyncadd (!%p819_p12), %s597_s18, 4294967168  ;;  %s30_s6 = sadd.s32 1, %s1166_s6   ;;  %s1604_s26 = smov %s1150_s27 }
 0x39b   : > { %p27_p2 = scmp.ge.s32.totalorder %s30_s6, 4   ;;  %s1605_s27 = smov %s1154_s28 }
 0x39c   : > { %s1606_s28 = smov %s1394_s20  ;;  %s1607_s29 = smov %s1162_s30 }
 0x39d   : > { %s1608_s30 = smov %s1610_s13  ;;  %29 = sbr.rel (!%p27_p2) target bundleno = 14 (0xe), region = 122 }
 0x3a4   :  { %602 = vsyncpa [#allocation4], 1 }
 0x3a5   :  { %604 = vsyncpa [#allocation4 + $0x1], 1 }
 0x3a6   :  { %605 = vsyncpa [#allocation7], 1 }
 0x3a7   :  { %607 = vsyncpa [#allocation7 + $0x1], 1 }
 0x3a8   :  { %608 = vsyncpa [#allocation10], 1 }
 0x3a9   :  { %609 = vsyncpa [#allocation13], 1 }
 0x3aa   :  { %610 = vsyncpa [#allocation5], 1 }
 0x3ab   :  { %612 = vsyncpa [#allocation5 + $0x1], 1 }

</bundles_post_ra>
